<compile_context>
chip_gen: v7x
topology: tpu7x:2x2x1
jax: 0.10.0
libtpu: 0.0.40
codegen_flags: <defaults>
</compile_context>

<pallas_src>
import functools
import math

import jax
import jax.numpy as jnp
from jax import lax
from jax.experimental import pallas as pl
from jax.experimental.pallas import tpu as pltpu


def _round_up(v, m):
    return ((v + m - 1) // m) * m


def _fc_kernel(x_ref, w_ref, b_ref, o_ref, acc_ref, *,
               weight_gain, bias_gain, activation, act_gain, act_alpha,
               has_bias):
    # grid = (Mp//tm, Np//tn, Kp//tk); K is the reduction ("arbitrary") axis.
    k = pl.program_id(2)

    @pl.when(k == 0)
    def _():
        acc_ref[...] = jnp.zeros_like(acc_ref)

    # x_tile: (tm, tk), w_tile: (tn, tk).  Contract over K with dot_general so
    # no explicit transpose / XLU relayout is emitted.
    acc_ref[...] += lax.dot_general(
        x_ref[...], w_ref[...],
        dimension_numbers=(((1,), (1,)), ((), ())),
        preferred_element_type=jnp.float32)

    # Epilogue (gain, bias, activation) exactly once, on the final k-step.
    @pl.when(k == pl.num_programs(2) - 1)
    def _():
        y = acc_ref[...] * jnp.float32(weight_gain)
        if has_bias:
            y = y + b_ref[...].astype(jnp.float32) * jnp.float32(bias_gain)
        if activation == 'linear':
            pass
        elif activation == 'relu':
            y = jnp.maximum(y, 0.0) * jnp.float32(act_gain)
        elif activation == 'lrelu':
            y = jnp.where(y >= 0.0, y, y * jnp.float32(act_alpha))
            y = y * jnp.float32(act_gain)
        else:
            # TODO(synk): other bias_act activations (tanh/sigmoid/elu/...) not wired up.
            raise NotImplementedError(activation)
        o_ref[...] = y.astype(o_ref.dtype)


def _pick_tiles(M, N, K, dtype):
    # Sublane packing: bf16 tiles pack 16 rows per vreg, f32 pack 8.
    sub = 16 if jnp.dtype(dtype) == jnp.dtype(jnp.bfloat16) else 8
    tm = min(_round_up(M, sub), 256)       # batch tile (whole batch if small)
    tn = min(_round_up(N, 128), 512)       # output-feature tile (lane-dense)
    tk = min(_round_up(K, 128), 512)       # reduction tile (lane-dense loads)
    return tm, tn, tk


def fully_connected_layer(x, weight, bias, *, activation='linear',
                          lr_multiplier=1.0, compute_dtype=None,
                          tm=None, tn=None, tk=None):
    """Pallas implementation of FullyConnectedLayer.forward.

    x:      [M, K]  (batch, in_features)
    weight: [N, K]  (out_features, in_features)  -- PyTorch convention
    bias:   [N] or None
    """
    M, K = x.shape
    N, K2 = weight.shape
    assert K == K2

    out_dtype = x.dtype
    dtype = out_dtype if compute_dtype is None else jnp.dtype(compute_dtype)

    tm0, tn0, tk0 = _pick_tiles(M, N, K, dtype)
    tm = tm0 if tm is None else tm
    tn = tn0 if tn is None else tn
    tk = tk0 if tk is None else tk

    # Pad everything to tile multiples; zero padding is exact for the matmul
    # and the padded output rows/cols are sliced away at the end.
    Mp, Np, Kp = _round_up(M, tm), _round_up(N, tn), _round_up(K, tk)

    xp = x.astype(dtype)
    wp = weight.astype(dtype)
    if (Mp, Kp) != (M, K):
        xp = jnp.pad(xp, ((0, Mp - M), (0, Kp - K)))
    if (Np, Kp) != (N, K):
        wp = jnp.pad(wp, ((0, Np - N), (0, Kp - K)))

    has_bias = bias is not None
    if has_bias:
        b2 = jnp.pad(bias.astype(dtype).reshape(1, N), ((0, 0), (0, Np - N)))
    else:
        b2 = jnp.zeros((1, Np), dtype=dtype)

    weight_gain = lr_multiplier / math.sqrt(K)
    bias_gain = lr_multiplier
    act_gain = {'linear': 1.0, 'relu': math.sqrt(2.0),
                'lrelu': math.sqrt(2.0)}[activation]
    act_alpha = 0.2  # only used for lrelu

    kernel = functools.partial(
        _fc_kernel,
        weight_gain=weight_gain,
        bias_gain=bias_gain,
        activation=activation,
        act_gain=act_gain,
        act_alpha=act_alpha,
        has_bias=has_bias,
    )

    grid = (Mp // tm, Np // tn, Kp // tk)

    # VMEM budget (double-buffered inputs/outputs + f32 accumulator); stay
    # within v7x's 64 MiB physical VMEM.
    isz = jnp.dtype(dtype).itemsize
    osz = jnp.dtype(out_dtype).itemsize
    vmem_est = (2 * (tm * tk + tn * tk) * isz   # x, w double-buffered
                + 2 * tm * tn * osz             # out double-buffered
                + 2 * tn * isz                  # bias
                + tm * tn * 4)                  # accumulator scratch
    vmem_limit = int(min(64 * 1024 * 1024,
                         max(32 * 1024 * 1024, 2 * vmem_est)))

    cost = pl.CostEstimate(
        flops=2 * Mp * Np * Kp,
        transcendentals=0,
        bytes_accessed=(Mp * Kp * isz + Np * Kp * isz + Np * isz
                        + Mp * Np * osz),
    )

    out = pl.pallas_call(
        kernel,
        out_shape=jax.ShapeDtypeStruct((Mp, Np), out_dtype),
        grid_spec=pltpu.PrefetchScalarGridSpec(
            num_scalar_prefetch=0,
            grid=grid,
            in_specs=[
                pl.BlockSpec((tm, tk), lambda i, j, k: (i, k)),   # x tile
                pl.BlockSpec((tn, tk), lambda i, j, k: (j, k)),   # weight tile
                pl.BlockSpec((1, tn), lambda i, j, k: (0, j)),    # bias tile
            ],
            out_specs=pl.BlockSpec((tm, tn), lambda i, j, k: (i, j)),
            scratch_shapes=[pltpu.VMEM((tm, tn), jnp.float32)],
        ),
        compiler_params=pltpu.CompilerParams(
            dimension_semantics=("parallel", "parallel", "arbitrary"),
            vmem_limit_bytes=vmem_limit),
        cost_estimate=cost,
    )(xp, wp, b2)

    return out[:M, :N]


def _reference(x, weight, bias, activation, lr_multiplier):
    weight_gain = lr_multiplier / math.sqrt(x.shape[1])
    w = weight.astype(jnp.float32) * weight_gain
    y = x.astype(jnp.float32) @ w.T
    if bias is not None:
        y = y + bias.astype(jnp.float32) * lr_multiplier
    if activation == 'lrelu':
        y = jnp.where(y >= 0, y, 0.2 * y) * math.sqrt(2.0)
    elif activation == 'relu':
        y = jnp.maximum(y, 0.0) * math.sqrt(2.0)
    return y.astype(x.dtype)


if __name__ == "__main__":
    key = jax.random.PRNGKey(0)
    kx, kw, kb = jax.random.split(key, 3)

    # Small, non-tile-aligned shapes to exercise the padding path as well.
    batch, in_features, out_features = 16, 96, 192
    lr_multiplier = 0.01           # as used for the StyleGAN mapping network
    weight_init = 1.0

    x = jax.random.normal(kx, (batch, in_features), dtype=jnp.float32)
    weight = jax.random.normal(kw, (out_features, in_features),
                               dtype=jnp.float32) * (weight_init / lr_multiplier)
    bias = jax.random.normal(kb, (out_features,), dtype=jnp.float32)

    # linear path (addmm equivalent)
    y_lin = fully_connected_layer(x, weight, bias, activation='linear',
                                  lr_multiplier=lr_multiplier)
    jax.block_until_ready(y_lin)
    ref_lin = _reference(x, weight, bias, 'linear', lr_multiplier)
    assert jnp.allclose(y_lin, ref_lin, atol=1e-4, rtol=1e-4)

    # lrelu path (matmul + bias_act equivalent)
    y_lrelu = fully_connected_layer(x, weight, bias, activation='lrelu',
                                    lr_multiplier=lr_multiplier)
    jax.block_until_ready(y_lrelu)
    ref_lrelu = _reference(x, weight, bias, 'lrelu', lr_multiplier)
    assert jnp.allclose(y_lrelu, ref_lrelu, atol=1e-4, rtol=1e-4)

    # no-bias path
    y_nb = fully_connected_layer(x, weight, None, activation='linear',
                                 lr_multiplier=lr_multiplier)
    jax.block_until_ready(y_nb)
    ref_nb = _reference(x, weight, None, 'linear', lr_multiplier)
    assert jnp.allclose(y_nb, ref_nb, atol=1e-4, rtol=1e-4)

    print("KERNEL_OK")
</pallas_src>

<mosaic_0001>
module attributes {stable_mosaic.version = 11 : i64} {
  func.func @_fc_kernel(%arg0: i32, %arg1: i32, %arg2: i32, %arg3: memref<16x128xf32, #tpu.memory_space<vmem>>, %arg4: memref<256x128xf32, #tpu.memory_space<vmem>>, %arg5: memref<1x256xf32, #tpu.memory_space<vmem>>, %arg6: memref<16x256xf32, #tpu.memory_space<vmem>>, %arg7: memref<16x256xf32, #tpu.memory_space<vmem>>) attributes {dimension_semantics = [#tpu.dimension_semantics<parallel>, #tpu.dimension_semantics<parallel>, #tpu.dimension_semantics<arbitrary>], iteration_bounds = array<i64: 1, 1, 1>, scalar_prefetch = 0 : i64, scratch_operands = 1 : i64, tpu.core_type = #tpu.core_type<tc>, window_params = [{transform_indices = @transform_0, window_bounds = array<i64: 16, 128>}, {transform_indices = @transform_1, window_bounds = array<i64: 256, 128>}, {transform_indices = @transform_2, window_bounds = array<i64: 1, 256>}, {transform_indices = @transform_3, window_bounds = array<i64: 16, 256>}]} {
    %c0_i32 = arith.constant 0 : i32
    %0 = arith.cmpi eq, %arg2, %c0_i32 : i32
    %1 = arith.extui %0 : i1 to i32
    %c0_i32_0 = arith.constant 0 : i32
    %2 = arith.cmpi ne, %1, %c0_i32_0 : i32
    scf.if %2 {
      %cst_10 = arith.constant 0.000000e+00 : f32
      %12 = vector.broadcast %cst_10 : f32 to vector<16x256xf32>
      %c0_11 = arith.constant 0 : index
      %c0_12 = arith.constant 0 : index
      %13 = vector.load %arg7[%c0_11, %c0_12] : memref<16x256xf32, #tpu.memory_space<vmem>>, vector<16x256xf32>
      tpu.vector_store %arg7[%c0_11, %c0_12], %12 {strides = array<i32>} : memref<16x256xf32, #tpu.memory_space<vmem>>, vector<16x256xf32>,
    } else {
    }
    %c0 = arith.constant 0 : index
    %c0_1 = arith.constant 0 : index
    %3 = vector.load %arg7[%c0, %c0_1] : memref<16x256xf32, #tpu.memory_space<vmem>>, vector<16x256xf32>
    %c0_2 = arith.constant 0 : index
    %c0_3 = arith.constant 0 : index
    %4 = vector.load %arg3[%c0_2, %c0_3] : memref<16x128xf32, #tpu.memory_space<vmem>>, vector<16x128xf32>
    %c0_4 = arith.constant 0 : index
    %c0_5 = arith.constant 0 : index
    %5 = vector.load %arg4[%c0_4, %c0_5] : memref<256x128xf32, #tpu.memory_space<vmem>>, vector<256x128xf32>
    %cst = arith.constant dense<0.000000e+00> : vector<16x256xf32>
    %6 = tpu.matmul %4, %5, %cst {dimension_numbers = #tpu.dot_dimension_numbers<[1], [1], [0], [0], [0, 0, 1, 0], [], []>} : vector<16x128xf32>, vector<256x128xf32>, vector<16x256xf32> -> vector<16x256xf32>
    %7 = arith.addf %3, %6 : vector<16x256xf32>
    %c0_6 = arith.constant 0 : index
    %c0_7 = arith.constant 0 : index
    %8 = vector.load %arg7[%c0_6, %c0_7] : memref<16x256xf32, #tpu.memory_space<vmem>>, vector<16x256xf32>
    tpu.vector_store %arg7[%c0_6, %c0_7], %7 {strides = array<i32>} : memref<16x256xf32, #tpu.memory_space<vmem>>, vector<16x256xf32>,
    %c0_i32_8 = arith.constant 0 : i32
    %9 = arith.cmpi eq, %arg2, %c0_i32_8 : i32
    %10 = arith.extui %9 : i1 to i32
    %c0_i32_9 = arith.constant 0 : i32
    %11 = arith.cmpi ne, %10, %c0_i32_9 : i32
    scf.if %11 {
      %c0_10 = arith.constant 0 : index
      %c0_11 = arith.constant 0 : index
      %12 = vector.load %arg7[%c0_10, %c0_11] : memref<16x256xf32, #tpu.memory_space<vmem>>, vector<16x256xf32>
      %cst_12 = arith.constant 0.00102062069 : f32
      %13 = vector.broadcast %cst_12 : f32 to vector<16x256xf32>
      %14 = arith.mulf %12, %13 : vector<16x256xf32>
      %c0_13 = arith.constant 0 : index
      %c0_14 = arith.constant 0 : index
      %15 = vector.load %arg5[%c0_13, %c0_14] : memref<1x256xf32, #tpu.memory_space<vmem>>, vector<1x256xf32>
      %cst_15 = arith.constant 0.00999999977 : f32
      %16 = vector.broadcast %cst_15 : f32 to vector<1x256xf32>
      %17 = arith.mulf %15, %16 : vector<1x256xf32>
      %18 = vector.broadcast %17 : vector<1x256xf32> to vector<16x256xf32>
      %19 = arith.addf %14, %18 : vector<16x256xf32>
      %c0_16 = arith.constant 0 : index
      %c0_17 = arith.constant 0 : index
      %20 = vector.load %arg6[%c0_16, %c0_17] : memref<16x256xf32, #tpu.memory_space<vmem>>, vector<16x256xf32>
      tpu.vector_store %arg6[%c0_16, %c0_17], %19 {strides = array<i32>} : memref<16x256xf32, #tpu.memory_space<vmem>>, vector<16x256xf32>,
    } else {
    }
    return
  }
  func.func @transform_0(%arg0: i32, %arg1: i32, %arg2: i32) -> (i32, i32) {
    %c0_i32 = arith.constant 0 : i32
    return %arg0, %arg2 : i32, i32
  }
  func.func @transform_1(%arg0: i32, %arg1: i32, %arg2: i32) -> (i32, i32) {
    %c0_i32 = arith.constant 0 : i32
    return %arg1, %arg2 : i32, i32
  }
  func.func @transform_2(%arg0: i32, %arg1: i32, %arg2: i32) -> (i32, i32) {
    %c0_i32 = arith.constant 0 : i32
    %c0_i32_0 = arith.constant 0 : i32
    return %c0_i32, %arg1 : i32, i32
  }
  func.func @transform_3(%arg0: i32, %arg1: i32, %arg2: i32) -> (i32, i32) {
    %c0_i32 = arith.constant 0 : i32
    return %arg0, %arg1 : i32, i32
  }
}

</mosaic_0001>

<bundles_post_ra>
// kernel: tpu_custom_call.1
= control target key start
LH: loop header
LB: loop body
LE: loop exit
PB: predicated region body
PF: predicated region fallthrough
CT: control target
= control target key end

     0   :  { %8 = vsyncpa [#allocation4], 0  ;;  %s453_s0 = inlined_call_operand.hbm [shape: f32[16,128], index: 0, kind: input, shape index: {}]   ;;  %s454_s1 = inlined_call_operand.hbm [shape: f32[256,128], index: 1, kind: input, shape index: {}]   ;;  %s455_s2 = inlined_call_operand.vmem [shape: f32[1,256], index: 2, kind: input, shape index: {}]   ;;  %s456_s3 = inlined_call_operand.hbm [shape: f32[16,256], index: 3, kind: output, shape index: {}]  }
   0x1   :  { %9 = vsyncpa [#allocation7], 0 }
   0x2   :  { %10 = vsyncpa [#allocation5], 0  ;;  %s387_s12 = smov [#allocation3]   ;;  %s315_s16 = scalar_lea.hbm %s453_s0, 256 }
   0x3   :  { %s16_s13 = sshll.u32 %s387_s12, 4  ;;  %p316_p0 = scmp.ne.s32.totalorder %s453_s0, %s315_s16  ;;  %s17_s13 = int_to_ptr.vmem [resolvable:$true] %s16_s13 }
   0x4   :  { %p319_p1 = scmp.lt.u32.totalorder %s315_s16, %s453_s0 }
   0x6   :  { %p321_p2 = pnand %p319_p1, %p316_p0 }
   0x8   :  { %324 = shalt.err (!%p321_p2)
}
   0x9   :  { %s325_s21 = scalar_lea.vmem %s17_s13, 256  ;;  %p330_p4 = scmp.lt.s32.totalorder %s17_s13, %s17_s13 }
   0xa   :  { %p326_p3 = scmp.ne.s32.totalorder %s17_s13, %s325_s21  ;;  %p331_p5 = scmp.lt.s32.totalorder %s325_s21, %s325_s21 }
   0xc   :  { %p332_p6 = por %p331_p5, %p330_p4 }
   0xe   :  { %p333_p7 = pnand %p332_p6, %p326_p3 }
  0x10   :  { %336 = shalt.err (!%p333_p7)
}
  0x11   :  { %s388_s22 = smov 128   ;;  %s389_s23 = smov 8  }
  0x12   :  { %22 = dma.hbm_to_vmem [thread:$0]  %s453_s0, 256, %s17_s13, [#allocation4], %s388_s22, %s388_s22, %s389_s23  }
  0x13   :  { %s390_s26 = smov [#allocation6]   ;;  %s337_s30 = scalar_lea.hbm %s454_s1, 4096 }
  0x14   :  { %s28_s27 = sshll.u32 %s390_s26, 4  ;;  %p338_p8 = scmp.ne.s32.totalorder %s454_s1, %s337_s30  ;;  %s29_s27 = int_to_ptr.vmem [resolvable:$true] %s28_s27 }
  0x15   :  { %p341_p9 = scmp.lt.u32.totalorder %s337_s30, %s454_s1 }
  0x17   :  { %p343_p10 = pnand %p341_p9, %p338_p8 }
  0x19   :  { %346 = shalt.err (!%p343_p10)
}
  0x1a   :  { %s347_s8 = scalar_lea.vmem %s29_s27, 4096  ;;  %p352_p12 = scmp.lt.s32.totalorder %s29_s27, %s29_s27 }
  0x1b   :  { %p348_p11 = scmp.ne.s32.totalorder %s29_s27, %s347_s8  ;;  %p353_p13 = scmp.lt.s32.totalorder %s347_s8, %s347_s8 }
  0x1d   :  { %p354_p0 = por %p353_p13, %p352_p12 }
  0x1f   :  { %p355_p1 = pnand %p354_p0, %p348_p11 }
  0x21   :  { %358 = shalt.err (!%p355_p1)
}
  0x22   :  { %34 = dma.hbm_to_vmem [thread:$0]  %s454_s1, 4096, %s29_s27, [#allocation7], %s388_s22, %s388_s22, %s389_s23  }
  0x23   :  { %381 = dma.done.wait [#allocation4], 256  }
  0x24   :  { %382 = vsyncadd [#allocation4], 4294967040 }
  0x25   :  { %383 = dma.done.wait [#allocation7], 4096  }
  0x26   :  { %384 = vsyncadd [#allocation7], 4294963200  ;;  %v73_v0 = vld [vmem:[#allocation6 + $0x80] sm:$0xff]  ;;  %v74_v1 = vld [vmem:[#allocation6 + $0x88] sm:$0xff]  ;;  %v188_v50 = vlaneseq  ;;  %s391_s11 = smov [#allocation8]  }
  0x27   :  { %v57_v2 = vld [vmem:[#allocation6] sm:$0xff]  ;;  %v260_v3 = vpack.c.bf16 %v74_v1, %v73_v0  ;;  %v58_v4 = vld [vmem:[#allocation6 + $0x8] sm:$0xff]  ;;  %v75_v5 = vld [vmem:[#allocation6 + $0x90] sm:$0xff]  ;;  %s211_s12 = sshll.u32 %s391_s11, 4  ;;  %s212_s12 = int_to_ptr.vmem [resolvable:$true] %s211_s12 }
  0x28   :  { %v76_v6 = vld [vmem:[#allocation6 + $0x98] sm:$0xff]  ;;  %v262_v7 = vpack.c.bf16 %v58_v4, %v57_v2  ;;  %v59_v9 = vld [vmem:[#allocation6 + $0x10] sm:$0xff]  ;;  %v77_v11 = vld [vmem:[#allocation6 + $0xa0] sm:$0xff]  ;;  %v189_v51 = vshrl.u32 %v188_v50, 7  ;;  %p364_p3 = scmp.lt.s32.totalorder %s212_s12, %s212_s12 }
  0x29   :  { %v264_v8 = vpack.c.bf16 %v76_v6, %v75_v5  ;;  %261 = vmatprep.subr.bf16.mxu0 %v260_v3  ;;  %292 = vmatprep.subr.bf16.mxu1 %v260_v3  ;;  %v60_v10 = vld [vmem:[#allocation6 + $0x18] sm:$0xff]  ;;  %v78_v12 = vld [vmem:[#allocation6 + $0xa8] sm:$0xff]  ;;  %v55_v15 = vld [vmem:[#allocation3] sm:$0xff] }
  0x2a   :  { %263 = vmatpush3.bf16.xpose.msra.mxu0 %v262_v7  ;;  %300 = vmatpush3.bf16.xpose.msra.mxu1 %v262_v7  ;;  %v266_v13 = vpack.c.bf16 %v60_v10, %v59_v9  ;;  %v268_v14 = vpack.c.bf16 %v78_v12, %v77_v11  ;;  %v56_v16 = vld [vmem:[#allocation3 + $0x8] sm:$0xff]  ;;  %v61_v17 = vld [vmem:[#allocation6 + $0x20] sm:$0xff]  ;;  %v62_v18 = vld [vmem:[#allocation6 + $0x28] sm:$0xff]  ;;  %v190_v54 = vsub.s32 0, %v189_v51  ;;  %v194_v55 = vsub.s32 1, %v189_v51 }
  0x2b   :  { %265 = vmatprep.subr.bf16.mxu0 %v264_v8  ;;  %293 = vmatprep.subr.bf16.mxu1 %v264_v8  ;;  %v79_v19 = vld [vmem:[#allocation6 + $0xb0] sm:$0xff]  ;;  %v80_v20 = vld [vmem:[#allocation6 + $0xb8] sm:$0xff]  ;;  %v270_v21 = vpack.c.bf16 %v62_v18, %v61_v17  ;;  %v81_v25 = vld [vmem:[#allocation6 + $0xc0] sm:$0xff] }
  0x2c   :  { %256 = vmatprep.mubr.f32.mxu0 %v55_v15  ;;  %258 = vmatprep.mubr.f32.mxu1 %v56_v16  ;;  %v272_v22 = vpack.c.bf16 %v80_v20, %v79_v19  ;;  %v63_v23 = vld [vmem:[#allocation6 + $0x30] sm:$0xff]  ;;  %v64_v24 = vld [vmem:[#allocation6 + $0x38] sm:$0xff]  ;;  %v82_v26 = vld [vmem:[#allocation6 + $0xc8] sm:$0xff] }
  0x2d   :  { %v274_v27 = vpack.c.bf16 %v64_v24, %v63_v23  ;;  %v276_v28 = vpack.c.bf16 %v82_v26, %v81_v25  ;;  %v65_v29 = vld [vmem:[#allocation6 + $0x40] sm:$0xff]  ;;  %v66_v30 = vld [vmem:[#allocation6 + $0x48] sm:$0xff]  ;;  %v83_v31 = vld [vmem:[#allocation6 + $0xd0] sm:$0xff] }
  0x2e   :  { %v84_v32 = vld [vmem:[#allocation6 + $0xd8] sm:$0xff]  ;;  %v278_v33 = vpack.c.bf16 %v66_v30, %v65_v29  ;;  %v67_v35 = vld [vmem:[#allocation6 + $0x50] sm:$0xff]  ;;  %v85_v37 = vld [vmem:[#allocation6 + $0xe0] sm:$0xff] }
  0x2f   :  { %v280_v34 = vpack.c.bf16 %v84_v32, %v83_v31  ;;  %v68_v36 = vld [vmem:[#allocation6 + $0x58] sm:$0xff]  ;;  %v86_v38 = vld [vmem:[#allocation6 + $0xe8] sm:$0xff]  ;;  %v69_v41 = vld [vmem:[#allocation6 + $0x60] sm:$0xff] }
  0x30   :  { %v282_v39 = vpack.c.bf16 %v68_v36, %v67_v35  ;;  %v284_v40 = vpack.c.bf16 %v86_v38, %v85_v37  ;;  %v70_v42 = vld [vmem:[#allocation6 + $0x68] sm:$0xff]  ;;  %v87_v43 = vld [vmem:[#allocation6 + $0xf0] sm:$0xff]  ;;  %v88_v44 = vld [vmem:[#allocation6 + $0xf8] sm:$0xff] }
  0x31   :  { %v286_v45 = vpack.c.bf16 %v70_v42, %v69_v41  ;;  %v288_v46 = vpack.c.bf16 %v88_v44, %v87_v43  ;;  %v71_v47 = vld [vmem:[#allocation6 + $0x70] sm:$0xff]  ;;  %v72_v48 = vld [vmem:[#allocation6 + $0x78] sm:$0xff] }
  0x32   :  { %267 = vmatpush3.bf16.xpose.msra.mxu0 %v266_v13  ;;  %301 = vmatpush3.bf16.xpose.msra.mxu1 %v266_v13  ;;  %v290_v49 = vpack.c.bf16 %v72_v48, %v71_v47  ;;  %v185_v52 = vld [vmem:[%s455_s2] sm:$0x3]  ;;  %s359_s2 = scalar_lea.vmem %s212_s12, 512 }
  0x33   :  { %269 = vmatprep.subr.bf16.mxu0 %v268_v14  ;;  %294 = vmatprep.subr.bf16.mxu1 %v268_v14  ;;  %v186_v53 = vmul.f32 0.01, %v185_v52  ;;  %p360_p2 = scmp.ne.s32.totalorder %s212_s12, %s359_s2  ;;  %p365_p4 = scmp.lt.s32.totalorder %s359_s2, %s359_s2 }
  0x35   :  { %v191_v56 = vrot.slane %v186_v53, %v190_v54  ;;  %v195_v59 = vrot.slane %v186_v53, %v194_v55  ;;  %p366_p5 = por %p365_p4, %p364_p3 }
  0x37   :  { %p367_p6 = pnand %p366_p5, %p360_p2 }
  0x3a   :  { %271 = vmatpush3.bf16.xpose.msra.mxu0 %v270_v21  ;;  %302 = vmatpush3.bf16.xpose.msra.mxu1 %v270_v21 }
  0x3b   :  { %273 = vmatprep.subr.bf16.mxu0 %v272_v22  ;;  %295 = vmatprep.subr.bf16.mxu1 %v272_v22 }
  0x42   :  { %275 = vmatpush3.bf16.xpose.msra.mxu0 %v274_v27  ;;  %303 = vmatpush3.bf16.xpose.msra.mxu1 %v274_v27 }
  0x43   :  { %277 = vmatprep.subr.bf16.mxu0 %v276_v28  ;;  %296 = vmatprep.subr.bf16.mxu1 %v276_v28 }
  0x4a   :  { %279 = vmatpush3.bf16.xpose.msra.mxu0 %v278_v33  ;;  %304 = vmatpush3.bf16.xpose.msra.mxu1 %v278_v33 }
  0x4b   :  { %281 = vmatprep.subr.bf16.mxu0 %v280_v34  ;;  %297 = vmatprep.subr.bf16.mxu1 %v280_v34 }
  0x52   :  { %283 = vmatpush3.bf16.xpose.msra.mxu0 %v282_v39  ;;  %305 = vmatpush3.bf16.xpose.msra.mxu1 %v282_v39 }
  0x53   :  { %285 = vmatprep.subr.bf16.mxu0 %v284_v40  ;;  %298 = vmatprep.subr.bf16.mxu1 %v284_v40 }
  0x5a   :  { %287 = vmatpush3.bf16.xpose.msra.mxu0 %v286_v45  ;;  %306 = vmatpush3.bf16.xpose.msra.mxu1 %v286_v45 }
  0x5b   :  { %289 = vmatprep.subr.bf16.mxu0 %v288_v46  ;;  %299 = vmatprep.subr.bf16.mxu1 %v288_v46 }
  0x62   :  { %291 = vmatpush3.bf16.xpose.msra.mxu0 %v290_v49  ;;  %307 = vmatpush3.bf16.xpose.msra.mxu1 %v290_v49 }
  0x69   :  { %257 = vmatmul.mubr.f32.vlgmr.msra.gmra.mrb[0].mxu0 %v55_v15  ;;  %259 = vmatmul.mubr.f32.vlgmr.msra.gmra.mrb[0].mxu1 %v56_v16 }
 0x13c   :  { %v155_v57 = vpop.f32.mrb[0].mxu0  ;;  %v161_v58 = vpop.f32.mrb[0].mxu1 }
 0x13d   :  { %v181_v60 = vmul.f32 0.0010206207, %v155_v57  ;;  %v183_v61 = vmul.f32 0.0010206207, %v161_v58  ;;  %v157_v62 = vpop.f32.mrb[1].mxu0  ;;  %v163_v63 = vpop.f32.mrb[1].mxu1 }
 0x13e   :  { %v182_v0 = vmul.f32 0.0010206207, %v157_v62  ;;  %v184_v1 = vmul.f32 0.0010206207, %v163_v63 }
 0x13f   :  { %v198_v2 = vadd.f32 %v191_v56, %v181_v60  ;;  %v200_v3 = vadd.f32 %v191_v56, %v183_v61 }
 0x140   :  { %v199_v4 = vadd.f32 %v195_v59, %v182_v0  ;;  %v201_v5 = vadd.f32 %v195_v59, %v184_v1 }
 0x141   :  { %202 = vst [vmem:[#allocation8] sm:$0xff] %v198_v2  ;;  %204 = vst [vmem:[#allocation8 + $0x10] sm:$0xff] %v200_v3 }
 0x142   :  { %203 = vst [vmem:[#allocation8 + $0x8] sm:$0xff] %v199_v4  ;;  %205 = vst [vmem:[#allocation8 + $0x18] sm:$0xff] %v201_v5 }
 0x143   :  { %370 = shalt.err (!%p367_p6)
}
 0x144   :  { %s371_s15 = scalar_lea.hbm %s456_s3, 512 }
 0x145   :  { %p372_p7 = scmp.ne.s32.totalorder %s456_s3, %s371_s15  ;;  %p375_p8 = scmp.lt.u32.totalorder %s371_s15, %s456_s3 }
 0x147   :  { %p377_p9 = pnand %p375_p8, %p372_p7 }
 0x149   :  { %380 = shalt.err (!%p377_p9)
}
 0x14a   :  { %s392_s20 = smov 256   ;;  %s393_s21 = smov 16  }
 0x14b   :  { %217 = dma.vmem_to_hbm [thread:$0]  %s212_s12, 512, %s456_s3, [#allocation5], %s392_s20, %s392_s20, %s393_s21  }
 0x14c   :  { %385 = dma.done.wait [#allocation5], 512  }
 0x14d   :  { %386 = vsyncadd [#allocation5], 4294966784 }
 0x14e   :  { %221 = vsyncpa [#allocation4], 1 }
 0x14f   :  { %222 = vsyncpa [#allocation7], 1 }
 0x150   :  { %223 = vsyncpa [#allocation5], 1 }

</bundles_post_ra>
